<compile_context>
chip_gen: v7x
topology: tpu7x:2x2x1
jax: 0.10.0
libtpu: 0.0.40
codegen_flags: <defaults>
</compile_context>

<pallas_src>
import functools

import jax
import jax.numpy as jnp
from jax import lax
from jax.experimental import pallas as pl
from jax.experimental.pallas import tpu as pltpu


def seqcnn_kernel(xwin_ref, cw_ref, wih_ref, whh_ref, b_ref,
                  fcw_ref, fcb_ref, out_ref, ig_ref, *, T, H):
    # ---- Batched input path (off the serial critical path) -----------------
    # conv     = relu(Xwin_aug @ cw_aug)          (T*8, C)   conv bias folded
    # in_gates = conv @ w_ih + (b_ih + b_hh)      (T*8, 4H)  order [i, f, o, g]
    conv = jnp.maximum(
        jnp.dot(xwin_ref[...], cw_ref[...], preferred_element_type=jnp.float32),
        0.0)
    ig_ref[...] = (jnp.dot(conv, wih_ref[...],
                           preferred_element_type=jnp.float32) + b_ref[...])

    whh = whh_ref[...]                                  # (H, 4H) loop-invariant

    def step(t, carry):
        h, c = carry
        # Aligned 8-row block for step t from the VMEM scratch ref.
        row = pl.multiple_of(t * 8, 8)
        gates = (ig_ref[pl.ds(row, 8), :]
                 + jnp.dot(h, whh, preferred_element_type=jnp.float32))
        # Gate order [i, f, o | g]: sigmoid on 3H lanes, tanh on H lanes only.
        sig = jax.nn.sigmoid(gates[:, 0:3 * H])          # i, f, o
        g_g = jnp.tanh(gates[:, 3 * H:4 * H])            # g
        i_g = sig[:, 0:H]
        f_g = sig[:, H:2 * H]
        o_g = sig[:, 2 * H:3 * H]
        c_new = f_g * c + i_g * g_g
        h_new = o_g * jnp.tanh(c_new)
        return h_new, c_new

    h0 = jnp.zeros((8, H), jnp.float32)
    c0 = jnp.zeros((8, H), jnp.float32)
    h, _ = lax.fori_loop(0, T, step, (h0, c0), unroll=True)

    # x = relu(h_last); x = fc(x)   (output padded to 128 lanes -> dense vst)
    h = jnp.maximum(h, 0.0)
    out_ref[...] = (jnp.dot(h, fcw_ref[...],
                            preferred_element_type=jnp.float32) + fcb_ref[...])


def seqcnn_forward(x, params):
    """Fused SeqCNN forward. x: (B, L) float32 -> (B, out_channels) float32."""
    B, L = x.shape
    C, K = params["conv_w"].shape
    H = params["w_hh"].shape[1]
    T = L - K + 1
    assert T >= 1

    # Batch padded to 8-row sublane blocks; fc output padded to full lane vreg.
    Bp = max(8, ((B + 7) // 8) * 8)
    nb = Bp // 8
    Cp = max(128, ((C + 127) // 128) * 128)

    xf = x.astype(jnp.float32)
    x_pad = jnp.zeros((Bp, L), jnp.float32).at[:B].set(xf)

    # im2col laid out as (batch-block, step, 8, K) so each grid program gets a
    # contiguous (T*8, K+1) slab and each LSTM step reads an aligned row block.
    xwin = jnp.stack([x_pad[:, t:t + K] for t in range(T)], axis=0)   # (T,Bp,K)
    xwin = xwin.reshape(T, nb, 8, K).transpose(1, 0, 2, 3).reshape(nb * T * 8, K)
    # Ones column folds the conv bias into the conv matmul.
    xwin_aug = jnp.concatenate(
        [xwin, jnp.ones((nb * T * 8, 1), jnp.float32)], axis=1)       # (.., K+1)

    # Glue: pre-transpose / reorder parameters (plain JAX, outside the kernel).
    cw_t = jnp.transpose(params["conv_w"]).astype(jnp.float32)        # (K, C)
    cb = params["conv_b"].reshape(1, C).astype(jnp.float32)           # (1, C)
    cw_aug = jnp.concatenate([cw_t, cb], axis=0)                      # (K+1, C)

    def reorder_gates(m):
        # PyTorch gate order [i, f, g, o] -> kernel order [i, f, o, g].
        return jnp.concatenate(
            [m[:, 0:2 * H], m[:, 3 * H:4 * H], m[:, 2 * H:3 * H]], axis=1)

    wih_t = reorder_gates(jnp.transpose(params["w_ih"]).astype(jnp.float32))  # (C,4H)
    whh_t = reorder_gates(jnp.transpose(params["w_hh"]).astype(jnp.float32))  # (H,4H)
    b = reorder_gates(
        (params["b_ih"] + params["b_hh"]).reshape(1, 4 * H).astype(jnp.float32))

    fcw_t = jnp.transpose(params["fc_w"]).astype(jnp.float32)         # (H, C)
    fcb = params["fc_b"].reshape(1, C).astype(jnp.float32)            # (1, C)
    fcw_p = jnp.zeros((H, Cp), jnp.float32).at[:, :C].set(fcw_t)
    fcb_p = jnp.zeros((1, Cp), jnp.float32).at[:, :C].set(fcb)

    kernel = functools.partial(seqcnn_kernel, T=T, H=H)

    out_p = pl.pallas_call(
        kernel,
        out_shape=jax.ShapeDtypeStruct((Bp, Cp), jnp.float32),
        grid=(nb,),
        in_specs=[
            pl.BlockSpec((T * 8, K + 1), lambda i: (i, 0)),   # im2col batch block
            pl.BlockSpec((K + 1, C), lambda i: (0, 0)),       # conv weight (+bias)
            pl.BlockSpec((C, 4 * H), lambda i: (0, 0)),       # w_ih
            pl.BlockSpec((H, 4 * H), lambda i: (0, 0)),       # w_hh
            pl.BlockSpec((1, 4 * H), lambda i: (0, 0)),       # b_ih + b_hh
            pl.BlockSpec((H, Cp), lambda i: (0, 0)),          # fc weight (padded)
            pl.BlockSpec((1, Cp), lambda i: (0, 0)),          # fc bias (padded)
        ],
        out_specs=pl.BlockSpec((8, Cp), lambda i: (i, 0)),
        scratch_shapes=[pltpu.VMEM((T * 8, 4 * H), jnp.float32)],     # in_gates
        compiler_params=pltpu.CompilerParams(
            dimension_semantics=("parallel",)),
    )(xwin_aug, cw_aug, wih_t, whh_t, b, fcw_p, fcb_p)
    return out_p[:B, :C]


def seqcnn_reference(x, params):
    """Pure-JAX reference implementation (PyTorch gate order)."""
    C, K = params["conv_w"].shape
    H = params["w_hh"].shape[1]
    B, L = x.shape
    T = L - K + 1

    def sigmoid(z):
        return 1.0 / (1.0 + jnp.exp(-z))

    h = jnp.zeros((B, H), jnp.float32)
    c = jnp.zeros((B, H), jnp.float32)
    for t in range(T):
        xt = x[:, t:t + K] @ params["conv_w"].T + params["conv_b"]
        xt = jnp.maximum(xt, 0.0)
        gates = xt @ params["w_ih"].T + h @ params["w_hh"].T \
            + params["b_ih"] + params["b_hh"]
        i_g = sigmoid(gates[:, 0:H])
        f_g = sigmoid(gates[:, H:2 * H])
        g_g = jnp.tanh(gates[:, 2 * H:3 * H])
        o_g = sigmoid(gates[:, 3 * H:4 * H])
        c = f_g * c + i_g * g_g
        h = o_g * jnp.tanh(c)
    h = jnp.maximum(h, 0.0)
    return h @ params["fc_w"].T + params["fc_b"]


def init_params(key, L, out_channels, kernel_size):
    """Deterministic synthetic init matching the PyTorch parameter shapes."""
    C, K, H = out_channels, kernel_size, L
    ks = jax.random.split(key, 8)
    # betas / cnn.weight: (C, 1, K) xavier_uniform -> squeeze in_channels.
    a = (6.0 / (K + C * K)) ** 0.5
    conv_w = jax.random.uniform(ks[0], (C, K), jnp.float32, -a, a)
    sb = 1.0 / (K ** 0.5)
    conv_b = jax.random.uniform(ks[1], (C,), jnp.float32, -sb, sb)
    s = 1.0 / (H ** 0.5)
    w_ih = jax.random.uniform(ks[2], (4 * H, C), jnp.float32, -s, s)
    w_hh = jax.random.uniform(ks[3], (4 * H, H), jnp.float32, -s, s)
    b_ih = jax.random.uniform(ks[4], (4 * H,), jnp.float32, -s, s)
    b_hh = jax.random.uniform(ks[5], (4 * H,), jnp.float32, -s, s)
    fc_w = jax.random.uniform(ks[6], (C, H), jnp.float32, -s, s)
    fc_b = jax.random.uniform(ks[7], (C,), jnp.float32, -s, s)
    return dict(conv_w=conv_w, conv_b=conv_b, w_ih=w_ih, w_hh=w_hh,
                b_ih=b_ih, b_hh=b_hh, fc_w=fc_w, fc_b=fc_b)


if __name__ == "__main__":
    key = jax.random.PRNGKey(0)
    B, L = 2, 16               # x: (batch, seq_len) -> hidden_size = L = 16
    out_channels = 4
    kernel_size = 8            # conv output length T = L - K + 1 = 9 LSTM steps

    k_x, k_p = jax.random.split(key)
    x = jax.random.normal(k_x, (B, L), jnp.float32)
    params = init_params(k_p, L, out_channels, kernel_size)

    out = jax.block_until_ready(seqcnn_forward(x, params))
    ref = jax.block_until_ready(seqcnn_reference(x, params))

    assert out.shape == (B, out_channels)
    assert jnp.allclose(out, ref, rtol=1e-3, atol=1e-4), (out, ref)
    print("KERNEL_OK")
</pallas_src>

<mosaic_0001>
module attributes {stable_mosaic.version = 11 : i64} {
  func.func @seqcnn_kernel(%arg0: i32, %arg1: memref<72x9xf32, #tpu.memory_space<vmem>>, %arg2: memref<9x4xf32, #tpu.memory_space<vmem>>, %arg3: memref<4x64xf32, #tpu.memory_space<vmem>>, %arg4: memref<16x64xf32, #tpu.memory_space<vmem>>, %arg5: memref<1x64xf32, #tpu.memory_space<vmem>>, %arg6: memref<16x128xf32, #tpu.memory_space<vmem>>, %arg7: memref<1x128xf32, #tpu.memory_space<vmem>>, %arg8: memref<8x128xf32, #tpu.memory_space<vmem>>, %arg9: memref<72x64xf32, #tpu.memory_space<vmem>>) attributes {dimension_semantics = [#tpu.dimension_semantics<parallel>], iteration_bounds = array<i64: 1>, scalar_prefetch = 0 : i64, scratch_operands = 1 : i64, tpu.core_type = #tpu.core_type<tc>, window_params = [{transform_indices = @transform_0, window_bounds = array<i64: 72, 9>}, {pipeline_mode = #tpu.pipeline_mode<synchronous>, transform_indices = @transform_1, window_bounds = array<i64: 9, 4>}, {pipeline_mode = #tpu.pipeline_mode<synchronous>, transform_indices = @transform_2, window_bounds = array<i64: 4, 64>}, {pipeline_mode = #tpu.pipeline_mode<synchronous>, transform_indices = @transform_3, window_bounds = array<i64: 16, 64>}, {pipeline_mode = #tpu.pipeline_mode<synchronous>, transform_indices = @transform_4, window_bounds = array<i64: 1, 64>}, {pipeline_mode = #tpu.pipeline_mode<synchronous>, transform_indices = @transform_5, window_bounds = array<i64: 16, 128>}, {pipeline_mode = #tpu.pipeline_mode<synchronous>, transform_indices = @transform_6, window_bounds = array<i64: 1, 128>}, {transform_indices = @transform_7, window_bounds = array<i64: 8, 128>}]} {
    %c0 = arith.constant 0 : index
    %c0_0 = arith.constant 0 : index
    %0 = vector.load %arg1[%c0, %c0_0] : memref<72x9xf32, #tpu.memory_space<vmem>>, vector<72x9xf32>
    %c0_1 = arith.constant 0 : index
    %c0_2 = arith.constant 0 : index
    %1 = vector.load %arg2[%c0_1, %c0_2] : memref<9x4xf32, #tpu.memory_space<vmem>>, vector<9x4xf32>
    %cst = arith.constant dense<0.000000e+00> : vector<72x4xf32>
    %2 = tpu.matmul %0, %1, %cst {dimension_numbers = #tpu.dot_dimension_numbers<[1], [0], [0], [1], [0, 0, 1, 1], [], []>} : vector<72x9xf32>, vector<9x4xf32>, vector<72x4xf32> -> vector<72x4xf32>
    %cst_3 = arith.constant 0.000000e+00 : f32
    %3 = vector.broadcast %cst_3 : f32 to vector<72x4xf32>
    %4 = arith.maximumf %2, %3 : vector<72x4xf32>
    %c0_4 = arith.constant 0 : index
    %c0_5 = arith.constant 0 : index
    %5 = vector.load %arg3[%c0_4, %c0_5] : memref<4x64xf32, #tpu.memory_space<vmem>>, vector<4x64xf32>
    %cst_6 = arith.constant dense<0.000000e+00> : vector<72x64xf32>
    %6 = tpu.matmul %4, %5, %cst_6 {dimension_numbers = #tpu.dot_dimension_numbers<[1], [0], [0], [1], [0, 0, 1, 1], [], []>} : vector<72x4xf32>, vector<4x64xf32>, vector<72x64xf32> -> vector<72x64xf32>
    %c0_7 = arith.constant 0 : index
    %c0_8 = arith.constant 0 : index
    %7 = vector.load %arg5[%c0_7, %c0_8] : memref<1x64xf32, #tpu.memory_space<vmem>>, vector<1x64xf32>
    %8 = vector.broadcast %7 : vector<1x64xf32> to vector<72x64xf32>
    %9 = arith.addf %6, %8 : vector<72x64xf32>
    %c0_9 = arith.constant 0 : index
    %c0_10 = arith.constant 0 : index
    %10 = vector.load %arg9[%c0_9, %c0_10] : memref<72x64xf32, #tpu.memory_space<vmem>>, vector<72x64xf32>
    tpu.vector_store %arg9[%c0_9, %c0_10], %9 {strides = array<i32>} : memref<72x64xf32, #tpu.memory_space<vmem>>, vector<72x64xf32>,
    %c0_11 = arith.constant 0 : index
    %c0_12 = arith.constant 0 : index
    %11 = vector.load %arg4[%c0_11, %c0_12] : memref<16x64xf32, #tpu.memory_space<vmem>>, vector<16x64xf32>
    %cst_13 = arith.constant 0.000000e+00 : f32
    %12 = vector.broadcast %cst_13 : f32 to vector<8x16xf32>
    %cst_14 = arith.constant 0.000000e+00 : f32
    %13 = vector.broadcast %cst_14 : f32 to vector<8x16xf32>
    %c0_i32 = arith.constant 0 : i32
    %c8_i32 = arith.constant 8 : i32
    %14 = arith.muli %c0_i32, %c8_i32 : i32
    %15 = tpu.assume_multiple %14, 8 : i32
    %16 = arith.index_cast %15 : i32 to index
    %c0_15 = arith.constant 0 : index
    %17 = vector.load %arg9[%16, %c0_15] : memref<72x64xf32, #tpu.memory_space<vmem>>, vector<8x64xf32>
    %cst_16 = arith.constant dense<0.000000e+00> : vector<8x64xf32>
    %18 = tpu.matmul %12, %11, %cst_16 {dimension_numbers = #tpu.dot_dimension_numbers<[1], [0], [0], [1], [0, 0, 1, 1], [], []>} : vector<8x16xf32>, vector<16x64xf32>, vector<8x64xf32> -> vector<8x64xf32>
    %19 = arith.addf %17, %18 : vector<8x64xf32>
    %20 = vector.extract_strided_slice %19 {offsets = [0, 0], sizes = [8, 48], strides = [1, 1]} : vector<8x64xf32> to vector<8x48xf32>
    %21 = arith.negf %20 : vector<8x48xf32>
    %22 = math.exp %21 : vector<8x48xf32>
    %cst_17 = arith.constant 1.000000e+00 : f32
    %23 = vector.broadcast %cst_17 : f32 to vector<8x48xf32>
    %24 = arith.addf %23, %22 : vector<8x48xf32>
    %25 = arith.divf %23, %24 : vector<8x48xf32>
    %26 = vector.extract_strided_slice %19 {offsets = [0, 48], sizes = [8, 16], strides = [1, 1]} : vector<8x64xf32> to vector<8x16xf32>
    %27 = math.tanh %26 : vector<8x16xf32>
    %28 = vector.extract_strided_slice %25 {offsets = [0, 0], sizes = [8, 16], strides = [1, 1]} : vector<8x48xf32> to vector<8x16xf32>
    %29 = vector.extract_strided_slice %25 {offsets = [0, 16], sizes = [8, 16], strides = [1, 1]} : vector<8x48xf32> to vector<8x16xf32>
    %30 = vector.extract_strided_slice %25 {offsets = [0, 32], sizes = [8, 16], strides = [1, 1]} : vector<8x48xf32> to vector<8x16xf32>
    %31 = arith.mulf %29, %13 : vector<8x16xf32>
    %32 = arith.mulf %28, %27 : vector<8x16xf32>
    %33 = arith.addf %31, %32 : vector<8x16xf32>
    %34 = math.tanh %33 : vector<8x16xf32>
    %35 = arith.mulf %30, %34 : vector<8x16xf32>
    %c1_i32 = arith.constant 1 : i32
    %c8_i32_18 = arith.constant 8 : i32
    %36 = arith.muli %c1_i32, %c8_i32_18 : i32
    %37 = tpu.assume_multiple %36, 8 : i32
    %38 = arith.index_cast %37 : i32 to index
    %c0_19 = arith.constant 0 : index
    %39 = vector.load %arg9[%38, %c0_19] : memref<72x64xf32, #tpu.memory_space<vmem>>, vector<8x64xf32>
    %cst_20 = arith.constant dense<0.000000e+00> : vector<8x64xf32>
    %40 = tpu.matmul %35, %11, %cst_20 {dimension_numbers = #tpu.dot_dimension_numbers<[1], [0], [0], [1], [0, 0, 1, 1], [], []>} : vector<8x16xf32>, vector<16x64xf32>, vector<8x64xf32> -> vector<8x64xf32>
    %41 = arith.addf %39, %40 : vector<8x64xf32>
    %42 = vector.extract_strided_slice %41 {offsets = [0, 0], sizes = [8, 48], strides = [1, 1]} : vector<8x64xf32> to vector<8x48xf32>
    %43 = arith.negf %42 : vector<8x48xf32>
    %44 = math.exp %43 : vector<8x48xf32>
    %cst_21 = arith.constant 1.000000e+00 : f32
    %45 = vector.broadcast %cst_21 : f32 to vector<8x48xf32>
    %46 = arith.addf %45, %44 : vector<8x48xf32>
    %47 = arith.divf %45, %46 : vector<8x48xf32>
    %48 = vector.extract_strided_slice %41 {offsets = [0, 48], sizes = [8, 16], strides = [1, 1]} : vector<8x64xf32> to vector<8x16xf32>
    %49 = math.tanh %48 : vector<8x16xf32>
    %50 = vector.extract_strided_slice %47 {offsets = [0, 0], sizes = [8, 16], strides = [1, 1]} : vector<8x48xf32> to vector<8x16xf32>
    %51 = vector.extract_strided_slice %47 {offsets = [0, 16], sizes = [8, 16], strides = [1, 1]} : vector<8x48xf32> to vector<8x16xf32>
    %52 = vector.extract_strided_slice %47 {offsets = [0, 32], sizes = [8, 16], strides = [1, 1]} : vector<8x48xf32> to vector<8x16xf32>
    %53 = arith.mulf %51, %33 : vector<8x16xf32>
    %54 = arith.mulf %50, %49 : vector<8x16xf32>
    %55 = arith.addf %53, %54 : vector<8x16xf32>
    %56 = math.tanh %55 : vector<8x16xf32>
    %57 = arith.mulf %52, %56 : vector<8x16xf32>
    %c2_i32 = arith.constant 2 : i32
    %c8_i32_22 = arith.constant 8 : i32
    %58 = arith.muli %c2_i32, %c8_i32_22 : i32
    %59 = tpu.assume_multiple %58, 8 : i32
    %60 = arith.index_cast %59 : i32 to index
    %c0_23 = arith.constant 0 : index
    %61 = vector.load %arg9[%60, %c0_23] : memref<72x64xf32, #tpu.memory_space<vmem>>, vector<8x64xf32>
    %cst_24 = arith.constant dense<0.000000e+00> : vector<8x64xf32>
    %62 = tpu.matmul %57, %11, %cst_24 {dimension_numbers = #tpu.dot_dimension_numbers<[1], [0], [0], [1], [0, 0, 1, 1], [], []>} : vector<8x16xf32>, vector<16x64xf32>, vector<8x64xf32> -> vector<8x64xf32>
    %63 = arith.addf %61, %62 : vector<8x64xf32>
    %64 = vector.extract_strided_slice %63 {offsets = [0, 0], sizes = [8, 48], strides = [1, 1]} : vector<8x64xf32> to vector<8x48xf32>
    %65 = arith.negf %64 : vector<8x48xf32>
    %66 = math.exp %65 : vector<8x48xf32>
    %cst_25 = arith.constant 1.000000e+00 : f32
    %67 = vector.broadcast %cst_25 : f32 to vector<8x48xf32>
    %68 = arith.addf %67, %66 : vector<8x48xf32>
    %69 = arith.divf %67, %68 : vector<8x48xf32>
    %70 = vector.extract_strided_slice %63 {offsets = [0, 48], sizes = [8, 16], strides = [1, 1]} : vector<8x64xf32> to vector<8x16xf32>
    %71 = math.tanh %70 : vector<8x16xf32>
    %72 = vector.extract_strided_slice %69 {offsets = [0, 0], sizes = [8, 16], strides = [1, 1]} : vector<8x48xf32> to vector<8x16xf32>
    %73 = vector.extract_strided_slice %69 {offsets = [0, 16], sizes = [8, 16], strides = [1, 1]} : vector<8x48xf32> to vector<8x16xf32>
    %74 = vector.extract_strided_slice %69 {offsets = [0, 32], sizes = [8, 16], strides = [1, 1]} : vector<8x48xf32> to vector<8x16xf32>
    %75 = arith.mulf %73, %55 : vector<8x16xf32>
    %76 = arith.mulf %72, %71 : vector<8x16xf32>
    %77 = arith.addf %75, %76 : vector<8x16xf32>
    %78 = math.tanh %77 : vector<8x16xf32>
    %79 = arith.mulf %74, %78 : vector<8x16xf32>
    %c3_i32 = arith.constant 3 : i32
    %c8_i32_26 = arith.constant 8 : i32
    %80 = arith.muli %c3_i32, %c8_i32_26 : i32
    %81 = tpu.assume_multiple %80, 8 : i32
    %82 = arith.index_cast %81 : i32 to index
    %c0_27 = arith.constant 0 : index
    %83 = vector.load %arg9[%82, %c0_27] : memref<72x64xf32, #tpu.memory_space<vmem>>, vector<8x64xf32>
    %cst_28 = arith.constant dense<0.000000e+00> : vector<8x64xf32>
    %84 = tpu.matmul %79, %11, %cst_28 {dimension_numbers = #tpu.dot_dimension_numbers<[1], [0], [0], [1], [0, 0, 1, 1], [], []>} : vector<8x16xf32>, vector<16x64xf32>, vector<8x64xf32> -> vector<8x64xf32>
    %85 = arith.addf %83, %84 : vector<8x64xf32>
    %86 = vector.extract_strided_slice %85 {offsets = [0, 0], sizes = [8, 48], strides = [1, 1]} : vector<8x64xf32> to vector<8x48xf32>
    %87 = arith.negf %86 : vector<8x48xf32>
    %88 = math.exp %87 : vector<8x48xf32>
    %cst_29 = arith.constant 1.000000e+00 : f32
    %89 = vector.broadcast %cst_29 : f32 to vector<8x48xf32>
    %90 = arith.addf %89, %88 : vector<8x48xf32>
    %91 = arith.divf %89, %90 : vector<8x48xf32>
    %92 = vector.extract_strided_slice %85 {offsets = [0, 48], sizes = [8, 16], strides = [1, 1]} : vector<8x64xf32> to vector<8x16xf32>
    %93 = math.tanh %92 : vector<8x16xf32>
    %94 = vector.extract_strided_slice %91 {offsets = [0, 0], sizes = [8, 16], strides = [1, 1]} : vector<8x48xf32> to vector<8x16xf32>
    %95 = vector.extract_strided_slice %91 {offsets = [0, 16], sizes = [8, 16], strides = [1, 1]} : vector<8x48xf32> to vector<8x16xf32>
    %96 = vector.extract_strided_slice %91 {offsets = [0, 32], sizes = [8, 16], strides = [1, 1]} : vector<8x48xf32> to vector<8x16xf32>
    %97 = arith.mulf %95, %77 : vector<8x16xf32>
    %98 = arith.mulf %94, %93 : vector<8x16xf32>
    %99 = arith.addf %97, %98 : vector<8x16xf32>
    %100 = math.tanh %99 : vector<8x16xf32>
    %101 = arith.mulf %96, %100 : vector<8x16xf32>
    %c4_i32 = arith.constant 4 : i32
    %c8_i32_30 = arith.constant 8 : i32
    %102 = arith.muli %c4_i32, %c8_i32_30 : i32
    %103 = tpu.assume_multiple %102, 8 : i32
    %104 = arith.index_cast %103 : i32 to index
    %c0_31 = arith.constant 0 : index
    %105 = vector.load %arg9[%104, %c0_31] : memref<72x64xf32, #tpu.memory_space<vmem>>, vector<8x64xf32>
    %cst_32 = arith.constant dense<0.000000e+00> : vector<8x64xf32>
    %106 = tpu.matmul %101, %11, %cst_32 {dimension_numbers = #tpu.dot_dimension_numbers<[1], [0], [0], [1], [0, 0, 1, 1], [], []>} : vector<8x16xf32>, vector<16x64xf32>, vector<8x64xf32> -> vector<8x64xf32>
    %107 = arith.addf %105, %106 : vector<8x64xf32>
    %108 = vector.extract_strided_slice %107 {offsets = [0, 0], sizes = [8, 48], strides = [1, 1]} : vector<8x64xf32> to vector<8x48xf32>
    %109 = arith.negf %108 : vector<8x48xf32>
    %110 = math.exp %109 : vector<8x48xf32>
    %cst_33 = arith.constant 1.000000e+00 : f32
    %111 = vector.broadcast %cst_33 : f32 to vector<8x48xf32>
    %112 = arith.addf %111, %110 : vector<8x48xf32>
    %113 = arith.divf %111, %112 : vector<8x48xf32>
    %114 = vector.extract_strided_slice %107 {offsets = [0, 48], sizes = [8, 16], strides = [1, 1]} : vector<8x64xf32> to vector<8x16xf32>
    %115 = math.tanh %114 : vector<8x16xf32>
    %116 = vector.extract_strided_slice %113 {offsets = [0, 0], sizes = [8, 16], strides = [1, 1]} : vector<8x48xf32> to vector<8x16xf32>
    %117 = vector.extract_strided_slice %113 {offsets = [0, 16], sizes = [8, 16], strides = [1, 1]} : vector<8x48xf32> to vector<8x16xf32>
    %118 = vector.extract_strided_slice %113 {offsets = [0, 32], sizes = [8, 16], strides = [1, 1]} : vector<8x48xf32> to vector<8x16xf32>
    %119 = arith.mulf %117, %99 : vector<8x16xf32>
    %120 = arith.mulf %116, %115 : vector<8x16xf32>
    %121 = arith.addf %119, %120 : vector<8x16xf32>
    %122 = math.tanh %121 : vector<8x16xf32>
    %123 = arith.mulf %118, %122 : vector<8x16xf32>
    %c5_i32 = arith.constant 5 : i32
    %c8_i32_34 = arith.constant 8 : i32
    %124 = arith.muli %c5_i32, %c8_i32_34 : i32
    %125 = tpu.assume_multiple %124, 8 : i32
    %126 = arith.index_cast %125 : i32 to index
    %c0_35 = arith.constant 0 : index
    %127 = vector.load %arg9[%126, %c0_35] : memref<72x64xf32, #tpu.memory_space<vmem>>, vector<8x64xf32>
    %cst_36 = arith.constant dense<0.000000e+00> : vector<8x64xf32>
    %128 = tpu.matmul %123, %11, %cst_36 {dimension_numbers = #tpu.dot_dimension_numbers<[1], [0], [0], [1], [0, 0, 1, 1], [], []>} : vector<8x16xf32>, vector<16x64xf32>, vector<8x64xf32> -> vector<8x64xf32>
    %129 = arith.addf %127, %128 : vector<8x64xf32>
    %130 = vector.extract_strided_slice %129 {offsets = [0, 0], sizes = [8, 48], strides = [1, 1]} : vector<8x64xf32> to vector<8x48xf32>
    %131 = arith.negf %130 : vector<8x48xf32>
    %132 = math.exp %131 : vector<8x48xf32>
    %cst_37 = arith.constant 1.000000e+00 : f32
    %133 = vector.broadcast %cst_37 : f32 to vector<8x48xf32>
    %134 = arith.addf %133, %132 : vector<8x48xf32>
    %135 = arith.divf %133, %134 : vector<8x48xf32>
    %136 = vector.extract_strided_slice %129 {offsets = [0, 48], sizes = [8, 16], strides = [1, 1]} : vector<8x64xf32> to vector<8x16xf32>
    %137 = math.tanh %136 : vector<8x16xf32>
    %138 = vector.extract_strided_slice %135 {offsets = [0, 0], sizes = [8, 16], strides = [1, 1]} : vector<8x48xf32> to vector<8x16xf32>
    %139 = vector.extract_strided_slice %135 {offsets = [0, 16], sizes = [8, 16], strides = [1, 1]} : vector<8x48xf32> to vector<8x16xf32>
    %140 = vector.extract_strided_slice %135 {offsets = [0, 32], sizes = [8, 16], strides = [1, 1]} : vector<8x48xf32> to vector<8x16xf32>
    %141 = arith.mulf %139, %121 : vector<8x16xf32>
    %142 = arith.mulf %138, %137 : vector<8x16xf32>
    %143 = arith.addf %141, %142 : vector<8x16xf32>
    %144 = math.tanh %143 : vector<8x16xf32>
    %145 = arith.mulf %140, %144 : vector<8x16xf32>
    %c6_i32 = arith.constant 6 : i32
    %c8_i32_38 = arith.constant 8 : i32
    %146 = arith.muli %c6_i32, %c8_i32_38 : i32
    %147 = tpu.assume_multiple %146, 8 : i32
    %148 = arith.index_cast %147 : i32 to index
    %c0_39 = arith.constant 0 : index
    %149 = vector.load %arg9[%148, %c0_39] : memref<72x64xf32, #tpu.memory_space<vmem>>, vector<8x64xf32>
    %cst_40 = arith.constant dense<0.000000e+00> : vector<8x64xf32>
    %150 = tpu.matmul %145, %11, %cst_40 {dimension_numbers = #tpu.dot_dimension_numbers<[1], [0], [0], [1], [0, 0, 1, 1], [], []>} : vector<8x16xf32>, vector<16x64xf32>, vector<8x64xf32> -> vector<8x64xf32>
    %151 = arith.addf %149, %150 : vector<8x64xf32>
    %152 = vector.extract_strided_slice %151 {offsets = [0, 0], sizes = [8, 48], strides = [1, 1]} : vector<8x64xf32> to vector<8x48xf32>
    %153 = arith.negf %152 : vector<8x48xf32>
    %154 = math.exp %153 : vector<8x48xf32>
    %cst_41 = arith.constant 1.000000e+00 : f32
    %155 = vector.broadcast %cst_41 : f32 to vector<8x48xf32>
    %156 = arith.addf %155, %154 : vector<8x48xf32>
    %157 = arith.divf %155, %156 : vector<8x48xf32>
    %158 = vector.extract_strided_slice %151 {offsets = [0, 48], sizes = [8, 16], strides = [1, 1]} : vector<8x64xf32> to vector<8x16xf32>
    %159 = math.tanh %158 : vector<8x16xf32>
    %160 = vector.extract_strided_slice %157 {offsets = [0, 0], sizes = [8, 16], strides = [1, 1]} : vector<8x48xf32> to vector<8x16xf32>
    %161 = vector.extract_strided_slice %157 {offsets = [0, 16], sizes = [8, 16], strides = [1, 1]} : vector<8x48xf32> to vector<8x16xf32>
    %162 = vector.extract_strided_slice %157 {offsets = [0, 32], sizes = [8, 16], strides = [1, 1]} : vector<8x48xf32> to vector<8x16xf32>
    %163 = arith.mulf %161, %143 : vector<8x16xf32>
    %164 = arith.mulf %160, %159 : vector<8x16xf32>
    %165 = arith.addf %163, %164 : vector<8x16xf32>
    %166 = math.tanh %165 : vector<8x16xf32>
    %167 = arith.mulf %162, %166 : vector<8x16xf32>
    %c7_i32 = arith.constant 7 : i32
    %c8_i32_42 = arith.constant 8 : i32
    %168 = arith.muli %c7_i32, %c8_i32_42 : i32
    %169 = tpu.assume_multiple %168, 8 : i32
    %170 = arith.index_cast %169 : i32 to index
    %c0_43 = arith.constant 0 : index
    %171 = vector.load %arg9[%170, %c0_43] : memref<72x64xf32, #tpu.memory_space<vmem>>, vector<8x64xf32>
    %cst_44 = arith.constant dense<0.000000e+00> : vector<8x64xf32>
    %172 = tpu.matmul %167, %11, %cst_44 {dimension_numbers = #tpu.dot_dimension_numbers<[1], [0], [0], [1], [0, 0, 1, 1], [], []>} : vector<8x16xf32>, vector<16x64xf32>, vector<8x64xf32> -> vector<8x64xf32>
    %173 = arith.addf %171, %172 : vector<8x64xf32>
    %174 = vector.extract_strided_slice %173 {offsets = [0, 0], sizes = [8, 48], strides = [1, 1]} : vector<8x64xf32> to vector<8x48xf32>
    %175 = arith.negf %174 : vector<8x48xf32>
    %176 = math.exp %175 : vector<8x48xf32>
    %cst_45 = arith.constant 1.000000e+00 : f32
    %177 = vector.broadcast %cst_45 : f32 to vector<8x48xf32>
    %178 = arith.addf %177, %176 : vector<8x48xf32>
    %179 = arith.divf %177, %178 : vector<8x48xf32>
    %180 = vector.extract_strided_slice %173 {offsets = [0, 48], sizes = [8, 16], strides = [1, 1]} : vector<8x64xf32> to vector<8x16xf32>
    %181 = math.tanh %180 : vector<8x16xf32>
    %182 = vector.extract_strided_slice %179 {offsets = [0, 0], sizes = [8, 16], strides = [1, 1]} : vector<8x48xf32> to vector<8x16xf32>
    %183 = vector.extract_strided_slice %179 {offsets = [0, 16], sizes = [8, 16], strides = [1, 1]} : vector<8x48xf32> to vector<8x16xf32>
    %184 = vector.extract_strided_slice %179 {offsets = [0, 32], sizes = [8, 16], strides = [1, 1]} : vector<8x48xf32> to vector<8x16xf32>
    %185 = arith.mulf %183, %165 : vector<8x16xf32>
    %186 = arith.mulf %182, %181 : vector<8x16xf32>
    %187 = arith.addf %185, %186 : vector<8x16xf32>
    %188 = math.tanh %187 : vector<8x16xf32>
    %189 = arith.mulf %184, %188 : vector<8x16xf32>
    %c8_i32_46 = arith.constant 8 : i32
    %c8_i32_47 = arith.constant 8 : i32
    %190 = arith.muli %c8_i32_46, %c8_i32_47 : i32
    %191 = tpu.assume_multiple %190, 8 : i32
    %192 = arith.index_cast %191 : i32 to index
    %c0_48 = arith.constant 0 : index
    %193 = vector.load %arg9[%192, %c0_48] : memref<72x64xf32, #tpu.memory_space<vmem>>, vector<8x64xf32>
    %cst_49 = arith.constant dense<0.000000e+00> : vector<8x64xf32>
    %194 = tpu.matmul %189, %11, %cst_49 {dimension_numbers = #tpu.dot_dimension_numbers<[1], [0], [0], [1], [0, 0, 1, 1], [], []>} : vector<8x16xf32>, vector<16x64xf32>, vector<8x64xf32> -> vector<8x64xf32>
    %195 = arith.addf %193, %194 : vector<8x64xf32>
    %196 = vector.extract_strided_slice %195 {offsets = [0, 0], sizes = [8, 48], strides = [1, 1]} : vector<8x64xf32> to vector<8x48xf32>
    %197 = arith.negf %196 : vector<8x48xf32>
    %198 = math.exp %197 : vector<8x48xf32>
    %cst_50 = arith.constant 1.000000e+00 : f32
    %199 = vector.broadcast %cst_50 : f32 to vector<8x48xf32>
    %200 = arith.addf %199, %198 : vector<8x48xf32>
    %201 = arith.divf %199, %200 : vector<8x48xf32>
    %202 = vector.extract_strided_slice %195 {offsets = [0, 48], sizes = [8, 16], strides = [1, 1]} : vector<8x64xf32> to vector<8x16xf32>
    %203 = math.tanh %202 : vector<8x16xf32>
    %204 = vector.extract_strided_slice %201 {offsets = [0, 0], sizes = [8, 16], strides = [1, 1]} : vector<8x48xf32> to vector<8x16xf32>
    %205 = vector.extract_strided_slice %201 {offsets = [0, 16], sizes = [8, 16], strides = [1, 1]} : vector<8x48xf32> to vector<8x16xf32>
    %206 = vector.extract_strided_slice %201 {offsets = [0, 32], sizes = [8, 16], strides = [1, 1]} : vector<8x48xf32> to vector<8x16xf32>
    %207 = arith.mulf %205, %187 : vector<8x16xf32>
    %208 = arith.mulf %204, %203 : vector<8x16xf32>
    %209 = arith.addf %207, %208 : vector<8x16xf32>
    %210 = math.tanh %209 : vector<8x16xf32>
    %211 = arith.mulf %206, %210 : vector<8x16xf32>
    %c9_i32 = arith.constant 9 : i32
    %cst_51 = arith.constant 0.000000e+00 : f32
    %212 = vector.broadcast %cst_51 : f32 to vector<8x16xf32>
    %213 = arith.maximumf %211, %212 : vector<8x16xf32>
    %c0_52 = arith.constant 0 : index
    %c0_53 = arith.constant 0 : index
    %214 = vector.load %arg6[%c0_52, %c0_53] : memref<16x128xf32, #tpu.memory_space<vmem>>, vector<16x128xf32>
    %cst_54 = arith.constant dense<0.000000e+00> : vector<8x128xf32>
    %215 = tpu.matmul %213, %214, %cst_54 {dimension_numbers = #tpu.dot_dimension_numbers<[1], [0], [0], [1], [0, 0, 1, 1], [], []>} : vector<8x16xf32>, vector<16x128xf32>, vector<8x128xf32> -> vector<8x128xf32>
    %c0_55 = arith.constant 0 : index
    %c0_56 = arith.constant 0 : index
    %216 = vector.load %arg7[%c0_55, %c0_56] : memref<1x128xf32, #tpu.memory_space<vmem>>, vector<1x128xf32>
    %217 = vector.broadcast %216 : vector<1x128xf32> to vector<8x128xf32>
    %218 = arith.addf %215, %217 : vector<8x128xf32>
    %c0_57 = arith.constant 0 : index
    %c0_58 = arith.constant 0 : index
    %219 = vector.load %arg8[%c0_57, %c0_58] : memref<8x128xf32, #tpu.memory_space<vmem>>, vector<8x128xf32>
    tpu.vector_store %arg8[%c0_57, %c0_58], %218 {strides = array<i32>} : memref<8x128xf32, #tpu.memory_space<vmem>>, vector<8x128xf32>,
    return
  }
  func.func @transform_0(%arg0: i32) -> (i32, i32) {
    %c0_i32 = arith.constant 0 : i32
    %c0_i32_0 = arith.constant 0 : i32
    return %arg0, %c0_i32 : i32, i32
  }
  func.func @transform_1(%arg0: i32) -> (i32, i32) {
    %c0_i32 = arith.constant 0 : i32
    %c0_i32_0 = arith.constant 0 : i32
    %c0_i32_1 = arith.constant 0 : i32
    return %c0_i32, %c0_i32_0 : i32, i32
  }
  func.func @transform_2(%arg0: i32) -> (i32, i32) {
    %c0_i32 = arith.constant 0 : i32
    %c0_i32_0 = arith.constant 0 : i32
    %c0_i32_1 = arith.constant 0 : i32
    return %c0_i32, %c0_i32_0 : i32, i32
  }
  func.func @transform_3(%arg0: i32) -> (i32, i32) {
    %c0_i32 = arith.constant 0 : i32
    %c0_i32_0 = arith.constant 0 : i32
    %c0_i32_1 = arith.constant 0 : i32
    return %c0_i32, %c0_i32_0 : i32, i32
  }
  func.func @transform_4(%arg0: i32) -> (i32, i32) {
    %c0_i32 = arith.constant 0 : i32
    %c0_i32_0 = arith.constant 0 : i32
    %c0_i32_1 = arith.constant 0 : i32
    return %c0_i32, %c0_i32_0 : i32, i32
  }
  func.func @transform_5(%arg0: i32) -> (i32, i32) {
    %c0_i32 = arith.constant 0 : i32
    %c0_i32_0 = arith.constant 0 : i32
    %c0_i32_1 = arith.constant 0 : i32
    return %c0_i32, %c0_i32_0 : i32, i32
  }
  func.func @transform_6(%arg0: i32) -> (i32, i32) {
    %c0_i32 = arith.constant 0 : i32
    %c0_i32_0 = arith.constant 0 : i32
    %c0_i32_1 = arith.constant 0 : i32
    return %c0_i32, %c0_i32_0 : i32, i32
  }
  func.func @transform_7(%arg0: i32) -> (i32, i32) {
    %c0_i32 = arith.constant 0 : i32
    %c0_i32_0 = arith.constant 0 : i32
    return %arg0, %c0_i32 : i32, i32
  }
}

</mosaic_0001>

<bundles_post_ra>
// kernel: tpu_custom_call.1
= control target key start
LH: loop header
LB: loop body
LE: loop exit
PB: predicated region body
PF: predicated region fallthrough
CT: control target
= control target key end

     0   :  { %vm66_vm0 = vcmask 1040384   ;;  %v1726_v2 = vmov 0.0|0.0   ;;  %vm1727_vm1 = vmmov 1   ;;  %vm1728_vm3 = vmmov 0   ;;  %s1992_s0 = inlined_call_operand.vmem [shape: f32[72,9], index: 0, kind: input, shape index: {}]   ;;  %s1993_s1 = inlined_call_operand.vmem [shape: f32[9,4], index: 1, kind: input, shape index: {}]   ;;  %s1994_s2 = inlined_call_operand.vmem [shape: f32[4,64], index: 2, kind: input, shape index: {}]   ;;  %s1995_s3 = inlined_call_operand.vmem [shape: f32[16,64], index: 3, kind: input, shape index: {}]   ;;  %s1996_s4 = inlined_call_operand.vmem [shape: f32[1,64], index: 4, kind: input, shape index: {}]   ;;  %s1997_s5 = inlined_call_operand.vmem [shape: f32[16,128], index: 5, kind: input, shape index: {}]   ;;  %s1998_s6 = inlined_call_operand.vmem [shape: f32[1,128], index: 6, kind: input, shape index: {}]   ;;  %s1999_s7 = inlined_call_operand.hbm [shape: f32[8,128], index: 7, kind: output, shape index: {}]  }
   0x1   :  { %v36_v0 = vld [vmem:[%s1993_s1] sm:$0xff]  ;;  %v37_v1 = vld [vmem:[%s1993_s1 + $0x8] sm:$0x1]  ;;  %1588 = vmatprep.subr.bf16.mxu0 %v1726_v2  ;;  %vm1590_vm2 = vmpackc.low %vm66_vm0, %vm1727_vm1  ;;  %v1729_v4 = vmov 0.0   ;;  %vm38_vm4 = vcmask 72704  }
   0x2   :  { %v1589_v3 = vpack.c.bf16 %v37_v1, %v36_v0  ;;  %1462 = vmatprep.mubr.msk.f32.mxu0 %vm1728_vm3, %v1729_v4  ;;  %1489 = vmatprep.subr.mxu1 %v1729_v4  ;;  %v27_v5 = vld [vmem:[%s1992_s0] sm:$0xff] }
   0x3   :  { %1491 = vmatprep.mubr.msk.f32.mxu1 %vm1728_vm3, %v1729_v4 }
   0x4   :  { %1591 = vmatpush3.bf16.msk.msra.mxu0 %vm1590_vm2, %v1589_v3 }
   0x5   :  { %1595 = vmatprep.subr.bf16.mxu0 %v1726_v2 }
   0x6   :  { %12 = vsyncpa [#allocation4], 0  ;;  %v28_v6 = vld [vmem:[%s1992_s0 + $0x8] sm:$0xff]  ;;  %v29_v7 = vld [vmem:[%s1992_s0 + $0x10] sm:$0xff]  ;;  %vm225_vm5 = vcmask 1043456   ;;  %vm197_vm6 = vcmask 31744  }
   0x7   :  { %1463 = vmatmul.mubr.msk.f32.vlgmr.msra.gmra.mrb[0].mxu0 %vm38_vm4, %v27_v5  ;;  %v30_v8 = vld [vmem:[%s1992_s0 + $0x18] sm:$0xff]  ;;  %v31_v9 = vld [vmem:[%s1992_s0 + $0x20] sm:$0xff]  ;;  %v32_v10 = vld [vmem:[%s1992_s0 + $0x28] sm:$0xff]  ;;  %vm339_vm7 = vcmask 523264   ;;  %s1732_s28 = smov 96   ;;  %vm352_vm8 = vcmask 130048  }
   0x8   :  { %1465 = vmatprep.mubr.msk.f32.mxu0 %vm1728_vm3, %v1729_v4  ;;  %v33_v11 = vld [vmem:[%s1992_s0 + $0x30] sm:$0xff]  ;;  %v34_v12 = vld [vmem:[%s1992_s0 + $0x38] sm:$0xff]  ;;  %v35_v13 = vld [vmem:[%s1992_s0 + $0x40] sm:$0xff]  ;;  %s1733_s11 = smov [#allocation3]  }
   0x9   :  { %v189_v14 = vld [vmem:[%s1994_s2] sm:$0xf]  ;;  %v350_v16 = vld [vmem:[%s1995_s3 + $0x8] sm:$0xff]  ;;  %s1359_s12 = sshll.u32 %s1733_s11, 4  ;;  %s1360_s12 = int_to_ptr.vmem [resolvable:$true] %s1359_s12 }
   0xa   :  { %1490 = vmatpush3.msk.msra.mxu1 %vm225_vm5, %v189_v14  ;;  %v349_v15 = vld [vmem:[%s1995_s3] sm:$0xff]  ;;  %s1730_s3 = smov 80   ;;  %p1707_p1 = scmp.lt.s32.totalorder %s1360_s12, %s1360_s12 }
   0xb   :  { %1466 = vmatmul.mubr.msk.f32.gmra.mrb[2].mxu0 %vm38_vm4, %v28_v6  ;;  %1592 = vmatprep.subr.bf16.mxu1 %v1726_v2  ;;  %v1851_v17 = vpack.c.bf16 %v350_v16, %v349_v15  ;;  %v1377_v45 = vld [vmem:[%s1996_s4] ss:$0 sm:$0xff]  ;;  %s1731_s4 = smov 16  }
   0xc   :  { %1468 = vmatprep.mubr.msk.f32.mxu0 %vm1728_vm3, %v1729_v4 }
   0xd   :  { %1597 = vmatpush3.bf16.msra.mxu0 %v1851_v17 }
   0xe   :  { %1601 = vmatprep.subr.bf16.mxu0 %v1726_v2 }
   0xf   :  { %1469 = vmatmul.mubr.msk.f32.gmra.mrb[4].mxu0 %vm38_vm4, %v29_v7 }
  0x10   :  { %1471 = vmatprep.mubr.msk.f32.mxu0 %vm1728_vm3, %v1729_v4 }
  0x13   :  { %1472 = vmatmul.mubr.msk.f32.gmra.mrb[6].mxu0 %vm38_vm4, %v30_v8 }
  0x14   :  { %1474 = vmatprep.mubr.msk.f32.mxu0 %vm1728_vm3, %v1729_v4 }
  0x17   :  { %1475 = vmatmul.mubr.msk.f32.gmra.mrb[8].mxu0 %vm38_vm4, %v31_v9 }
  0x18   :  { %1477 = vmatprep.mubr.msk.f32.mxu0 %vm1728_vm3, %v1729_v4 }
  0x1b   :  { %1478 = vmatmul.mubr.msk.f32.gmra.mrb[10].mxu0 %vm38_vm4, %v32_v10 }
  0x1c   :  { %1480 = vmatprep.mubr.msk.f32.mxu0 %vm1728_vm3, %v1729_v4 }
  0x1f   :  { %1481 = vmatmul.mubr.msk.f32.gmra.mrb[12].mxu0 %vm38_vm4, %v33_v11 }
  0x20   :  { %1483 = vmatprep.mubr.msk.f32.mxu0 %vm1728_vm3, %v1729_v4 }
  0x23   :  { %1484 = vmatmul.mubr.msk.f32.gmra.mrb[14].mxu0 %vm38_vm4, %v34_v12 }
  0x24   :  { %1486 = vmatprep.mubr.msk.f32.mxu0 %vm1728_vm3, %v1729_v4 }
  0x27   :  { %1487 = vmatmul.mubr.msk.f32.gmra.mrb[16].mxu0 %vm38_vm4, %v35_v13 }
  0x28   :  { %1529 = vmatprep.mubr.msk.f32.mxu0 %vm1728_vm3, %v1729_v4 }
  0xda   :  { %v136_v18 = vpop.f32.mrb[0].mxu0 }
  0xdb   :  { %v180_v19 = vmax.f32 %v136_v18, 0.0  ;;  %v1464_v20 = vpop.f32.mrb[1].mxu0 }
  0xdd   :  { %1492 = vmatmul.mubr.msk.f32.vlgmr.msra.gmra.mrb[0].mxu1 %vm197_vm6, %v180_v19 }
  0xde   :  { %1594 = vmatpush3.bf16.msra.mxu1 %v1851_v17  ;;  %v141_v21 = vpop.f32.mrb[2].mxu0  ;;  %1494 = vmatprep.mubr.msk.f32.mxu1 %vm1728_vm3, %v1729_v4 }
  0xdf   :  { %v181_v22 = vmax.f32 %v141_v21, 0.0  ;;  %v1467_v23 = vpop.f32.mrb[3].mxu0  ;;  %1598 = vmatprep.subr.bf16.mxu1 %v1726_v2 }
  0xe1   :  { %1495 = vmatmul.mubr.msk.f32.gmra.mrb[2].mxu1 %vm197_vm6, %v181_v22 }
  0xe2   :  { %v146_v24 = vpop.f32.mrb[4].mxu0  ;;  %1497 = vmatprep.mubr.msk.f32.mxu1 %vm1728_vm3, %v1729_v4 }
  0xe3   :  { %v182_v25 = vmax.f32 %v146_v24, 0.0  ;;  %v1470_v26 = vpop.f32.mrb[5].mxu0 }
  0xe5   :  { %1498 = vmatmul.mubr.msk.f32.gmra.mrb[4].mxu1 %vm197_vm6, %v182_v25 }
  0xe6   :  { %v151_v27 = vpop.f32.mrb[6].mxu0  ;;  %1500 = vmatprep.mubr.msk.f32.mxu1 %vm1728_vm3, %v1729_v4 }
  0xe7   :  { %v183_v28 = vmax.f32 %v151_v27, 0.0  ;;  %v1473_v29 = vpop.f32.mrb[7].mxu0 }
  0xe9   :  { %1501 = vmatmul.mubr.msk.f32.gmra.mrb[6].mxu1 %vm197_vm6, %v183_v28 }
  0xea   :  { %v156_v30 = vpop.f32.mrb[8].mxu0  ;;  %1503 = vmatprep.mubr.msk.f32.mxu1 %vm1728_vm3, %v1729_v4 }
  0xeb   :  { %v184_v31 = vmax.f32 %v156_v30, 0.0  ;;  %v1476_v32 = vpop.f32.mrb[9].mxu0 }
  0xed   :  { %1504 = vmatmul.mubr.msk.f32.gmra.mrb[8].mxu1 %vm197_vm6, %v184_v31 }
  0xee   :  { %v161_v33 = vpop.f32.mrb[10].mxu0  ;;  %1506 = vmatprep.mubr.msk.f32.mxu1 %vm1728_vm3, %v1729_v4 }
  0xef   :  { %v185_v34 = vmax.f32 %v161_v33, 0.0  ;;  %v1479_v35 = vpop.f32.mrb[11].mxu0 }
  0xf1   :  { %1507 = vmatmul.mubr.msk.f32.gmra.mrb[10].mxu1 %vm197_vm6, %v185_v34 }
  0xf2   :  { %v166_v36 = vpop.f32.mrb[12].mxu0  ;;  %1509 = vmatprep.mubr.msk.f32.mxu1 %vm1728_vm3, %v1729_v4 }
  0xf3   :  { %v186_v37 = vmax.f32 %v166_v36, 0.0  ;;  %v1482_v38 = vpop.f32.mrb[13].mxu0 }
  0xf5   :  { %1510 = vmatmul.mubr.msk.f32.gmra.mrb[12].mxu1 %vm197_vm6, %v186_v37 }
  0xf6   :  { %v171_v39 = vpop.f32.mrb[14].mxu0  ;;  %1512 = vmatprep.mubr.msk.f32.mxu1 %vm1728_vm3, %v1729_v4 }
  0xf7   :  { %v187_v40 = vmax.f32 %v171_v39, 0.0  ;;  %v1485_v41 = vpop.f32.mrb[15].mxu0 }
  0xf9   :  { %1513 = vmatmul.mubr.msk.f32.gmra.mrb[14].mxu1 %vm197_vm6, %v187_v40 }
  0xfa   :  { %v176_v42 = vpop.f32.mrb[16].mxu0  ;;  %1515 = vmatprep.mubr.msk.f32.mxu1 %vm1728_vm3, %v1729_v4 }
  0xfb   :  { %v188_v43 = vmax.f32 %v176_v42, 0.0  ;;  %v1488_v44 = vpop.f32.mrb[17].mxu0 }
  0xfd   :  { %1516 = vmatmul.mubr.msk.f32.gmra.mrb[16].mxu1 %vm197_vm6, %v188_v43 }
  0xfe   :  { %1522 = vmatprep.mubr.msk.f32.mxu1 %vm1728_vm3, %v1729_v4 }
 0x101   :  { %1523 = vmatmul.mubr.f32.vlgmr.msra.gmra.mrb[18].mxu1 %v1729_v4 }
 0x102   :  { %1600 = vmatpush3.bf16.msra.mxu1 %v1851_v17  ;;  %1536 = vmatprep.mubr.msk.f32.mxu1 %vm1728_vm3, %v1729_v4 }
 0x103   :  { %1604 = vmatprep.subr.bf16.mxu1 %v1726_v2 }
 0x1b0   :  { %v295_v46 = vpop.f32.mrb[0].mxu1 }
 0x1b1   :  { %v296_v47 = vadd.f32 %v1377_v45, %v295_v46  ;;  %v1493_v48 = vpop.f32.mrb[1].mxu1 }
 0x1b3   :  { %340 = vst.msk [vmem:[#allocation2] sm:$0xff] %vm339_vm7, %v296_v47 }
 0x1b4   :  { %v300_v49 = vpop.f32.mrb[2].mxu1 }
 0x1b5   :  { %v301_v50 = vadd.f32 %v1377_v45, %v300_v49  ;;  %v1496_v51 = vpop.f32.mrb[3].mxu1 }
 0x1b7   :  { %341 = vst.msk [vmem:[#allocation2 + $0x8] sm:$0xff] %vm339_vm7, %v301_v50 }
 0x1b8   :  { %v305_v52 = vpop.f32.mrb[4].mxu1 }
 0x1b9   :  { %v306_v53 = vadd.f32 %v1377_v45, %v305_v52  ;;  %v1499_v54 = vpop.f32.mrb[5].mxu1 }
 0x1ba   :  { %v351_v11 = vld [vmem:[#allocation2] sm:$0xff] }
 0x1bb   :  { %342 = vst.msk [vmem:[#allocation2 + $0x10] sm:$0xff] %vm339_vm7, %v306_v53 }
 0x1bc   :  { %v310_v55 = vpop.f32.mrb[6].mxu1 }
 0x1bd   :  { %v311_v56 = vadd.f32 %v1377_v45, %v310_v55  ;;  %v1502_v57 = vpop.f32.mrb[7].mxu1 }
 0x1be   :  { %v452_v30 = vld [vmem:[#allocation2 + $0x8] sm:$0xff] }
 0x1bf   :  { %343 = vst.msk [vmem:[#allocation2 + $0x18] sm:$0xff] %vm339_vm7, %v311_v56 }
 0x1c0   :  { %v315_v58 = vpop.f32.mrb[8].mxu1 }
 0x1c1   :  { %v316_v59 = vadd.f32 %v1377_v45, %v315_v58  ;;  %v1505_v60 = vpop.f32.mrb[9].mxu1 }
 0x1c2   :  { %v554_v48 = vld [vmem:[#allocation2 + $0x10] sm:$0xff] }
 0x1c3   :  { %344 = vst.msk [vmem:[#allocation2 + $0x20] sm:$0xff] %vm339_vm7, %v316_v59 }
 0x1c4   :  { %v320_v61 = vpop.f32.mrb[10].mxu1 }
 0x1c5   :  { %v321_v62 = vadd.f32 %v1377_v45, %v320_v61  ;;  %v1508_v63 = vpop.f32.mrb[11].mxu1 }
 0x1c7   :  { %345 = vst.msk [vmem:[#allocation2 + $0x28] sm:$0xff] %vm339_vm7, %v321_v62 }
 0x1c8   :  { %v325_v0 = vpop.f32.mrb[12].mxu1 }
 0x1c9   :  { %v326_v1 = vadd.f32 %v1377_v45, %v325_v0  ;;  %v1511_v3 = vpop.f32.mrb[13].mxu1 }
 0x1ca   :  { %v656_v3 = vld [vmem:[#allocation2 + $0x18] sm:$0xff] }
 0x1cb   :  { %346 = vst.msk [vmem:[#allocation2 + $0x30] sm:$0xff] %vm339_vm7, %v326_v1 }
 0x1cc   :  { %v330_v5 = vpop.f32.mrb[14].mxu1 }
 0x1cd   :  { %v331_v6 = vadd.f32 %v1377_v45, %v330_v5  ;;  %v1514_v7 = vpop.f32.mrb[15].mxu1 }
 0x1cf   :  { %347 = vst.msk [vmem:[#allocation2 + $0x38] sm:$0xff] %vm339_vm7, %v331_v6 }
 0x1d0   :  { %v335_v8 = vpop.f32.mrb[16].mxu1 }
 0x1d1   :  { %v336_v9 = vadd.f32 %v1377_v45, %v335_v8  ;;  %v1517_v10 = vpop.f32.mrb[17].mxu1 }
 0x1d3   :  { %348 = vst.msk [vmem:[#allocation2 + $0x40] sm:$0xff] %vm339_vm7, %v336_v9 }
 0x1d4   :  { %v422_v12 = vpop.f32.mrb[18].mxu1 }
 0x1d5   :  { %v426_v13 = vadd.f32 %v422_v12, %v351_v11  ;;  %v1524_v14 = vpop.f32.mrb[19].mxu1 }
 0x1d7   :  { %1630 = vtanh.f32 %v426_v13  ;;  %v1388_v16 = vmul.f32 -1.442695, %v426_v13 }
 0x1d9   :  { %1632 = vpow2.f32 %v1388_v16 }
 0x1e1   :  { %v1631_v15 = vpop.eup %1630 }
 0x1e2   :  { %436 = vrot.lane.b32.xlu0 %v1631_v15, %s1730_s3 }
 0x1e3   :  { %v1633_v18 = vpop.eup %1632 }
 0x1e4   :  { %v430_v19 = vadd.f32 1.0, %v1633_v18 }
 0x1e6   :  { %1634 = vrcp.f32 %v430_v19 }
 0x1f0   :  { %v1635_v20 = vpop.eup %1634 }
 0x1f1   :  { %v434_v23 = vmul.f32 0.0, %v1635_v20 }
 0x254   :  { %v437_v21 = vpop.permute.xlu0 %436 }
 0x255   :  { %v439_v22 = vmul.f32 %v1635_v20, %v437_v21 }
 0x257   :  { %441 = vrot.lane.b32.xlu0 %v439_v22, %s1731_s4 }
 0x2c9   :  { %v442_v24 = vpop.permute.xlu0 %441 }
 0x2ca   :  { %v444_v25 = vadd.f32 %v442_v24, %v434_v23  ;;  %v758_v23 = vld [vmem:[#allocation2 + $0x20] sm:$0xff] }
 0x2cc   :  { %1636 = vtanh.f32 %v444_v25 }
 0x2d6   :  { %v1637_v26 = vpop.eup %1636 }
 0x2d7   :  { %447 = vrot.lane.b32.xlu1 %v1637_v26, %s1731_s4 }
 0x349   :  { %v448_v27 = vpop.permute.xlu1 %447 }
 0x34a   :  { %v450_v28 = vmul.f32 %v1635_v20, %v448_v27 }
 0x34c   :  { %454 = vrot.lane.b32.xlu1 %v450_v28, %s1732_s28 }
 0x3be   :  { %v455_v29 = vpop.permute.xlu1 %454 }
 0x3bf   :  { %1530 = vmatmul.mubr.msk.f32.vlgmr.msra.gmra.mrb[18].mxu0 %vm352_vm8, %v455_v29 }
 0x3c0   :  { %1603 = vmatpush3.bf16.msra.mxu0 %v1851_v17  ;;  %1543 = vmatprep.mubr.msk.f32.mxu0 %vm1728_vm3, %v1729_v4 }
 0x3c1   :  { %1607 = vmatprep.subr.bf16.mxu0 %v1726_v2 }
 0x492   :  { %v524_v31 = vpop.f32.mrb[18].mxu0 }
 0x493   :  { %v528_v32 = vadd.f32 %v524_v31, %v452_v30  ;;  %v1531_v33 = vpop.f32.mrb[19].mxu0 }
 0x495   :  { %1638 = vtanh.f32 %v528_v32  ;;  %v1390_v35 = vmul.f32 -1.442695, %v528_v32 }
 0x497   :  { %1640 = vpow2.f32 %v1390_v35 }
 0x49f   :  { %v1639_v34 = vpop.eup %1638 }
 0x4a0   :  { %538 = vrot.lane.b32.xlu0 %v1639_v34, %s1730_s3 }
 0x4a1   :  { %v1641_v36 = vpop.eup %1640 }
 0x4a2   :  { %v532_v37 = vadd.f32 1.0, %v1641_v36 }
 0x4a4   :  { %1642 = vrcp.f32 %v532_v37 }
 0x4ae   :  { %v1643_v38 = vpop.eup %1642 }
 0x4af   :  { %v536_v41 = vmul.f32 %v1643_v38, %v444_v25 }
 0x512   :  { %v539_v39 = vpop.permute.xlu0 %538 }
 0x513   :  { %v541_v40 = vmul.f32 %v1643_v38, %v539_v39 }
 0x515   :  { %543 = vrot.lane.b32.xlu1 %v541_v40, %s1731_s4 }
 0x587   :  { %v544_v42 = vpop.permute.xlu1 %543 }
 0x588   :  { %v546_v43 = vadd.f32 %v544_v42, %v536_v41  ;;  %v860_v41 = vld [vmem:[#allocation2 + $0x28] sm:$0xff] }
 0x58a   :  { %1644 = vtanh.f32 %v546_v43 }
 0x594   :  { %v1645_v44 = vpop.eup %1644 }
 0x595   :  { %549 = vrot.lane.b32.xlu0 %v1645_v44, %s1731_s4 }
 0x607   :  { %v550_v45 = vpop.permute.xlu0 %549 }
 0x608   :  { %v552_v46 = vmul.f32 %v1643_v38, %v550_v45 }
 0x60a   :  { %556 = vrot.lane.b32.xlu1 %v552_v46, %s1732_s28 }
 0x67c   :  { %v557_v47 = vpop.permute.xlu1 %556 }
 0x67d   :  { %1537 = vmatmul.mubr.msk.f32.vlgmr.msra.gmra.mrb[20].mxu1 %vm352_vm8, %v557_v47 }
 0x67e   :  { %1606 = vmatpush3.bf16.msra.mxu1 %v1851_v17  ;;  %1550 = vmatprep.mubr.msk.f32.mxu1 %vm1728_vm3, %v1729_v4 }
 0x67f   :  { %1610 = vmatprep.subr.bf16.mxu1 %v1726_v2 }
 0x750   :  { %v626_v49 = vpop.f32.mrb[20].mxu1 }
 0x751   :  { %v630_v50 = vadd.f32 %v626_v49, %v554_v48  ;;  %v1538_v51 = vpop.f32.mrb[21].mxu1 }
 0x753   :  { %1646 = vtanh.f32 %v630_v50  ;;  %v1392_v53 = vmul.f32 -1.442695, %v630_v50 }
 0x755   :  { %1648 = vpow2.f32 %v1392_v53 }
 0x75d   :  { %v1647_v52 = vpop.eup %1646 }
 0x75e   :  { %640 = vrot.lane.b32.xlu0 %v1647_v52, %s1730_s3 }
 0x75f   :  { %v1649_v54 = vpop.eup %1648 }
 0x760   :  { %v634_v55 = vadd.f32 1.0, %v1649_v54 }
 0x762   :  { %1650 = vrcp.f32 %v634_v55 }
 0x76c   :  { %v1651_v56 = vpop.eup %1650 }
 0x76d   :  { %v638_v59 = vmul.f32 %v1651_v56, %v546_v43 }
 0x7d0   :  { %v641_v57 = vpop.permute.xlu0 %640 }
 0x7d1   :  { %v643_v58 = vmul.f32 %v1651_v56, %v641_v57 }
 0x7d3   :  { %645 = vrot.lane.b32.xlu1 %v643_v58, %s1731_s4  ;;  %v962_v58 = vld [vmem:[#allocation2 + $0x30] sm:$0xff] }
 0x845   :  { %v646_v60 = vpop.permute.xlu1 %645 }
 0x846   :  { %v648_v61 = vadd.f32 %v646_v60, %v638_v59 }
 0x848   :  { %1652 = vtanh.f32 %v648_v61 }
 0x852   :  { %v1653_v62 = vpop.eup %1652 }
 0x853   :  { %651 = vrot.lane.b32.xlu0 %v1653_v62, %s1731_s4 }
 0x8c5   :  { %v652_v63 = vpop.permute.xlu0 %651 }
 0x8c6   :  { %v654_v0 = vmul.f32 %v1651_v56, %v652_v63 }
 0x8c8   :  { %658 = vrot.lane.b32.xlu1 %v654_v0, %s1732_s28 }
 0x93a   :  { %v659_v1 = vpop.permute.xlu1 %658 }
 0x93b   :  { %1544 = vmatmul.mubr.msk.f32.vlgmr.msra.gmra.mrb[20].mxu0 %vm352_vm8, %v659_v1 }
 0x93c   :  { %1609 = vmatpush3.bf16.msra.mxu0 %v1851_v17  ;;  %1557 = vmatprep.mubr.msk.f32.mxu0 %vm1728_vm3, %v1729_v4 }
 0x93d   :  { %1613 = vmatprep.subr.bf16.mxu0 %v1726_v2 }
 0xa0e   :  { %v728_v5 = vpop.f32.mrb[20].mxu0 }
 0xa0f   :  { %v732_v6 = vadd.f32 %v728_v5, %v656_v3  ;;  %v1545_v7 = vpop.f32.mrb[21].mxu0 }
 0xa11   :  { %1654 = vtanh.f32 %v732_v6  ;;  %v1394_v9 = vmul.f32 -1.442695, %v732_v6 }
 0xa13   :  { %1656 = vpow2.f32 %v1394_v9 }
 0xa1b   :  { %v1655_v8 = vpop.eup %1654 }
 0xa1c   :  { %742 = vrot.lane.b32.xlu0 %v1655_v8, %s1730_s3 }
 0xa1d   :  { %v1657_v10 = vpop.eup %1656 }
 0xa1e   :  { %v736_v11 = vadd.f32 1.0, %v1657_v10 }
 0xa20   :  { %1658 = vrcp.f32 %v736_v11 }
 0xa2a   :  { %v1659_v12 = vpop.eup %1658 }
 0xa2b   :  { %v740_v15 = vmul.f32 %v1659_v12, %v648_v61 }
 0xa8e   :  { %v743_v13 = vpop.permute.xlu0 %742 }
 0xa8f   :  { %v745_v14 = vmul.f32 %v1659_v12, %v743_v13  ;;  %v1064_v13 = vld [vmem:[#allocation2 + $0x38] sm:$0xff] }
 0xa91   :  { %747 = vrot.lane.b32.xlu1 %v745_v14, %s1731_s4 }
 0xb03   :  { %v748_v16 = vpop.permute.xlu1 %747 }
 0xb04   :  { %v750_v18 = vadd.f32 %v748_v16, %v740_v15 }
 0xb06   :  { %1660 = vtanh.f32 %v750_v18 }
 0xb10   :  { %v1661_v19 = vpop.eup %1660 }
 0xb11   :  { %753 = vrot.lane.b32.xlu0 %v1661_v19, %s1731_s4 }
 0xb83   :  { %v754_v20 = vpop.permute.xlu0 %753 }
 0xb84   :  { %v756_v21 = vmul.f32 %v1659_v12, %v754_v20 }
 0xb86   :  { %760 = vrot.lane.b32.xlu1 %v756_v21, %s1732_s28 }
 0xbf8   :  { %v761_v22 = vpop.permute.xlu1 %760 }
 0xbf9   :  { %1551 = vmatmul.mubr.msk.f32.vlgmr.msra.gmra.mrb[22].mxu1 %vm352_vm8, %v761_v22 }
 0xbfa   :  { %1612 = vmatpush3.bf16.msra.mxu1 %v1851_v17  ;;  %1564 = vmatprep.mubr.msk.f32.mxu1 %vm1728_vm3, %v1729_v4 }
 0xbfb   :  { %1616 = vmatprep.subr.bf16.mxu1 %v1726_v2 }
 0xccc   :  { %v830_v24 = vpop.f32.mrb[22].mxu1 }
 0xccd   :  { %v834_v25 = vadd.f32 %v830_v24, %v758_v23  ;;  %v1552_v26 = vpop.f32.mrb[23].mxu1 }
 0xccf   :  { %1662 = vtanh.f32 %v834_v25  ;;  %v1396_v28 = vmul.f32 -1.442695, %v834_v25 }
 0xcd1   :  { %1664 = vpow2.f32 %v1396_v28 }
 0xcd9   :  { %v1663_v27 = vpop.eup %1662 }
 0xcda   :  { %844 = vrot.lane.b32.xlu0 %v1663_v27, %s1730_s3 }
 0xcdb   :  { %v1665_v29 = vpop.eup %1664 }
 0xcdc   :  { %v838_v30 = vadd.f32 1.0, %v1665_v29 }
 0xcde   :  { %1666 = vrcp.f32 %v838_v30 }
 0xce8   :  { %v1667_v31 = vpop.eup %1666 }
 0xce9   :  { %v842_v34 = vmul.f32 %v1667_v31, %v750_v18 }
 0xd4c   :  { %v845_v32 = vpop.permute.xlu0 %844 }
 0xd4d   :  { %v847_v33 = vmul.f32 %v1667_v31, %v845_v32 }
 0xd4f   :  { %849 = vrot.lane.b32.xlu1 %v847_v33, %s1731_s4 }
 0xdc1   :  { %v850_v35 = vpop.permute.xlu1 %849 }
 0xdc2   :  { %v852_v36 = vadd.f32 %v850_v35, %v842_v34 }
 0xdc4   :  { %1668 = vtanh.f32 %v852_v36 }
 0xdce   :  { %v1669_v37 = vpop.eup %1668 }
 0xdcf   :  { %855 = vrot.lane.b32.xlu0 %v1669_v37, %s1731_s4 }
 0xe41   :  { %v856_v38 = vpop.permute.xlu0 %855 }
 0xe42   :  { %v858_v39 = vmul.f32 %v1667_v31, %v856_v38  ;;  %v1166_v31 = vld [vmem:[#allocation2 + $0x40] sm:$0xff] }
 0xe44   :  { %862 = vrot.lane.b32.xlu1 %v858_v39, %s1732_s28 }
 0xeb6   :  { %v863_v40 = vpop.permute.xlu1 %862 }
 0xeb7   :  { %1558 = vmatmul.mubr.msk.f32.vlgmr.msra.gmra.mrb[22].mxu0 %vm352_vm8, %v863_v40 }
 0xeb8   :  { %1615 = vmatpush3.bf16.msra.mxu0 %v1851_v17  ;;  %1571 = vmatprep.mubr.msk.f32.mxu0 %vm1728_vm3, %v1729_v4 }
 0xeb9   :  { %1619 = vmatprep.subr.bf16.mxu0 %v1726_v2 }
 0xf8a   :  { %v932_v42 = vpop.f32.mrb[22].mxu0 }
 0xf8b   :  { %v936_v43 = vadd.f32 %v932_v42, %v860_v41  ;;  %v1559_v44 = vpop.f32.mrb[23].mxu0 }
 0xf8d   :  { %1670 = vtanh.f32 %v936_v43  ;;  %v1398_v46 = vmul.f32 -1.442695, %v936_v43 }
 0xf8f   :  { %1672 = vpow2.f32 %v1398_v46  ;;  %v1269_v46 = vld [vmem:[%s1997_s5 + $0x8] sm:$0xff] }
 0xf97   :  { %v1671_v45 = vpop.eup %1670 }
 0xf98   :  { %946 = vrot.lane.b32.xlu0 %v1671_v45, %s1730_s3  ;;  %v1268_v45 = vld [vmem:[%s1997_s5] sm:$0xff]  ;;  %s1702_s5 = scalar_lea.vmem %s1360_s12, 128 }
 0xf99   :  { %v1673_v47 = vpop.eup %1672  ;;  %p1703_p0 = scmp.ne.s32.totalorder %s1360_s12, %s1702_s5  ;;  %p1708_p2 = scmp.lt.s32.totalorder %s1702_s5, %s1702_s5 }
 0xf9a   :  { %v940_v48 = vadd.f32 1.0, %v1673_v47  ;;  %v1620_v47 = vpack.c.bf16 %v1269_v46, %v1268_v45 }
 0xf9b   :  { %p1709_p3 = por %p1708_p2, %p1707_p1 }
 0xf9c   :  { %1674 = vrcp.f32 %v940_v48 }
 0xf9d   :  { %p1710_p4 = pnand %p1709_p3, %p1703_p0 }
 0xfa6   :  { %v1675_v49 = vpop.eup %1674 }
 0xfa7   :  { %v944_v52 = vmul.f32 %v1675_v49, %v852_v36 }
0x100a   :  { %v947_v50 = vpop.permute.xlu0 %946 }
0x100b   :  { %v949_v51 = vmul.f32 %v1675_v49, %v947_v50 }
0x100d   :  { %951 = vrot.lane.b32.xlu1 %v949_v51, %s1731_s4 }
0x107f   :  { %v952_v2 = vpop.permute.xlu1 %951 }
0x1080   :  { %v954_v53 = vadd.f32 %v952_v2, %v944_v52  ;;  %v1405_v2 = vld [vmem:[%s1998_s6] ss:$0 sm:$0xff] }
0x1082   :  { %1676 = vtanh.f32 %v954_v53 }
0x108c   :  { %v1677_v54 = vpop.eup %1676 }
0x108d   :  { %957 = vrot.lane.b32.xlu0 %v1677_v54, %s1731_s4 }
0x10ff   :  { %v958_v55 = vpop.permute.xlu0 %957 }
0x1100   :  { %v960_v56 = vmul.f32 %v1675_v49, %v958_v55 }
0x1102   :  { %964 = vrot.lane.b32.xlu1 %v960_v56, %s1732_s28 }
0x1174   :  { %v965_v57 = vpop.permute.xlu1 %964 }
0x1175   :  { %1565 = vmatmul.mubr.msk.f32.vlgmr.msra.gmra.mrb[24].mxu1 %vm352_vm8, %v965_v57 }
0x1176   :  { %1618 = vmatpush3.bf16.msra.mxu1 %v1851_v17  ;;  %1578 = vmatprep.mubr.msk.f32.mxu1 %vm1728_vm3, %v1729_v4 }
0x1248   :  { %v1034_v59 = vpop.f32.mrb[24].mxu1 }
0x1249   :  { %v1038_v60 = vadd.f32 %v1034_v59, %v962_v58  ;;  %v1566_v61 = vpop.f32.mrb[25].mxu1 }
0x124b   :  { %1678 = vtanh.f32 %v1038_v60  ;;  %v1400_v63 = vmul.f32 -1.442695, %v1038_v60 }
0x124d   :  { %1680 = vpow2.f32 %v1400_v63 }
0x1255   :  { %v1679_v62 = vpop.eup %1678 }
0x1256   :  { %1048 = vrot.lane.b32.xlu0 %v1679_v62, %s1730_s3 }
0x1257   :  { %v1681_v0 = vpop.eup %1680 }
0x1258   :  { %v1042_v1 = vadd.f32 1.0, %v1681_v0 }
0x125a   :  { %1682 = vrcp.f32 %v1042_v1 }
0x1264   :  { %v1683_v3 = vpop.eup %1682 }
0x1265   :  { %v1046_v17 = vmul.f32 %v1683_v3, %v954_v53 }
0x12c8   :  { %v1049_v5 = vpop.permute.xlu0 %1048 }
0x12c9   :  { %v1051_v6 = vmul.f32 %v1683_v3, %v1049_v5 }
0x12cb   :  { %1053 = vrot.lane.b32.xlu1 %v1051_v6, %s1731_s4 }
0x133d   :  { %v1054_v7 = vpop.permute.xlu1 %1053 }
0x133e   :  { %v1056_v8 = vadd.f32 %v1054_v7, %v1046_v17 }
0x1340   :  { %1684 = vtanh.f32 %v1056_v8 }
0x134a   :  { %v1685_v9 = vpop.eup %1684 }
0x134b   :  { %1059 = vrot.lane.b32.xlu0 %v1685_v9, %s1731_s4 }
0x13bd   :  { %v1060_v10 = vpop.permute.xlu0 %1059 }
0x13be   :  { %v1062_v11 = vmul.f32 %v1683_v3, %v1060_v10 }
0x13c0   :  { %1066 = vrot.lane.b32.xlu1 %v1062_v11, %s1732_s28 }
0x1432   :  { %v1067_v12 = vpop.permute.xlu1 %1066 }
0x1433   :  { %1572 = vmatmul.mubr.msk.f32.vlgmr.msra.gmra.mrb[24].mxu0 %vm352_vm8, %v1067_v12 }
0x1434   :  { %1585 = vmatprep.mubr.msk.f32.mxu0 %vm1728_vm3, %v1729_v4  ;;  %1621 = vmatpush3.bf16.msra.mxu0 %v1620_v47 }
0x1506   :  { %v1136_v14 = vpop.f32.mrb[24].mxu0 }
0x1507   :  { %v1140_v15 = vadd.f32 %v1136_v14, %v1064_v13  ;;  %v1573_v16 = vpop.f32.mrb[25].mxu0 }
0x1509   :  { %1686 = vtanh.f32 %v1140_v15  ;;  %v1402_v19 = vmul.f32 -1.442695, %v1140_v15 }
0x150b   :  { %1688 = vpow2.f32 %v1402_v19 }
0x1513   :  { %v1687_v18 = vpop.eup %1686 }
0x1514   :  { %1150 = vrot.lane.b32.xlu0 %v1687_v18, %s1730_s3 }
0x1515   :  { %v1689_v20 = vpop.eup %1688 }
0x1516   :  { %v1144_v21 = vadd.f32 1.0, %v1689_v20 }
0x1518   :  { %1690 = vrcp.f32 %v1144_v21 }
0x1522   :  { %v1691_v22 = vpop.eup %1690 }
0x1523   :  { %v1148_v25 = vmul.f32 %v1691_v22, %v1056_v8 }
0x1586   :  { %v1151_v23 = vpop.permute.xlu0 %1150 }
0x1587   :  { %v1153_v24 = vmul.f32 %v1691_v22, %v1151_v23 }
0x1589   :  { %1155 = vrot.lane.b32.xlu1 %v1153_v24, %s1731_s4 }
0x15fb   :  { %v1156_v4 = vpop.permute.xlu1 %1155 }
0x15fc   :  { %v1158_v26 = vadd.f32 %v1156_v4, %v1148_v25 }
0x15fe   :  { %1692 = vtanh.f32 %v1158_v26 }
0x1608   :  { %v1693_v27 = vpop.eup %1692 }
0x1609   :  { %1161 = vrot.lane.b32.xlu0 %v1693_v27, %s1731_s4 }
0x167b   :  { %v1162_v28 = vpop.permute.xlu0 %1161 }
0x167c   :  { %v1164_v29 = vmul.f32 %v1691_v22, %v1162_v28 }
0x167e   :  { %1168 = vrot.lane.b32.xlu1 %v1164_v29, %s1732_s28 }
0x16f0   :  { %v1169_v30 = vpop.permute.xlu1 %1168 }
0x16f1   :  { %1579 = vmatmul.mubr.msk.f32.vlgmr.msra.gmra.mrb[26].mxu1 %vm352_vm8, %v1169_v30 }
0x17c4   :  { %v1238_v32 = vpop.f32.mrb[26].mxu1 }
0x17c5   :  { %v1242_v33 = vadd.f32 %v1238_v32, %v1166_v31  ;;  %v1580_v34 = vpop.f32.mrb[27].mxu1 }
0x17c7   :  { %1694 = vtanh.f32 %v1242_v33  ;;  %v1404_v36 = vmul.f32 -1.442695, %v1242_v33 }
0x17c9   :  { %1696 = vpow2.f32 %v1404_v36 }
0x17d1   :  { %v1695_v35 = vpop.eup %1694 }
0x17d2   :  { %1252 = vrot.lane.b32.xlu0 %v1695_v35, %s1730_s3 }
0x17d3   :  { %v1697_v37 = vpop.eup %1696 }
0x17d4   :  { %v1246_v38 = vadd.f32 1.0, %v1697_v37 }
0x17d6   :  { %1698 = vrcp.f32 %v1246_v38 }
0x17e0   :  { %v1699_v39 = vpop.eup %1698 }
0x17e1   :  { %v1250_v42 = vmul.f32 %v1699_v39, %v1158_v26 }
0x1844   :  { %v1253_v40 = vpop.permute.xlu0 %1252 }
0x1845   :  { %v1255_v41 = vmul.f32 %v1699_v39, %v1253_v40 }
0x1847   :  { %1257 = vrot.lane.b32.xlu1 %v1255_v41, %s1731_s4 }
0x18b9   :  { %v1258_v43 = vpop.permute.xlu1 %1257 }
0x18ba   :  { %v1260_v44 = vadd.f32 %v1258_v43, %v1250_v42 }
0x18bc   :  { %1700 = vtanh.f32 %v1260_v44 }
0x18c6   :  { %v1701_v48 = vpop.eup %1700 }
0x18c7   :  { %1263 = vrot.lane.b32.xlu0 %v1701_v48, %s1731_s4 }
0x1939   :  { %v1264_v49 = vpop.permute.xlu0 %1263 }
0x193a   :  { %v1266_v50 = vmul.f32 %v1699_v39, %v1264_v49 }
0x193c   :  { %v1267_v51 = vmax.f32 %v1266_v50, 0.0 }
0x193e   :  { %1278 = vrot.lane.b32.xlu1 %v1267_v51, %s1732_s28 }
0x19b0   :  { %v1279_v52 = vpop.permute.xlu1 %1278 }
0x19b1   :  { %1586 = vmatmul.mubr.msk.f32.vlgmr.msra.gmra.mrb[26].mxu0 %vm352_vm8, %v1279_v52 }
0x1a84   :  { %v1348_v53 = vpop.f32.mrb[26].mxu0 }
0x1a85   :  { %v1349_v54 = vadd.f32 %v1405_v2, %v1348_v53  ;;  %v1587_v55 = vpop.f32.mrb[27].mxu0 }
0x1a87   :  { %1352 = vst [vmem:[#allocation3] sm:$0xff] %v1349_v54 }
0x1a88   :  { %1713 = shalt.err (!%p1710_p4)
}
0x1a89   :  { %s1714_s15 = scalar_lea.hbm %s1999_s7, 128 }
0x1a8a   :  { %p1715_p5 = scmp.ne.s32.totalorder %s1999_s7, %s1714_s15  ;;  %p1718_p6 = scmp.lt.u32.totalorder %s1714_s15, %s1999_s7 }
0x1a8c   :  { %p1720_p7 = pnand %p1718_p6, %p1715_p5 }
0x1a8e   :  { %1723 = shalt.err (!%p1720_p7)
}
0x1a8f   :  { %1362 = dma.vmem_to_hbm [thread:$0]  %s1360_s12, 128, %s1999_s7, [#allocation4]  }
0x1a90   :  { %1724 = dma.done.wait [#allocation4], 128  }
0x1a91   :  { %1725 = vsyncadd [#allocation4], 4294967168 }
0x1a92   :  { %1366 = vsyncpa [#allocation4], 1 }

</bundles_post_ra>
